<compile_context>
chip_gen: v6e
topology: v6e:2x2x1
jax: 0.10.0
libtpu: 0.0.40
codegen_flags: <defaults>
</compile_context>

<pallas_src>
import jax
import jax.numpy as jnp
from jax.experimental import pallas as pl
from jax.experimental.pallas import tpu as pltpu

LN_EPS = 1e-5  # PyTorch nn.LayerNorm default


def _round_up(x, m):
    return ((x + m - 1) // m) * m


# ----------------------------------------------------------------------------- kernel
def _part_block_kernel(x_ref, w_ref, r_ref, b_ref, g_ref, bt_ref, o_ref):
    # x_ref : (Nt, P*Cin)      bf16  lane-packed activations (streamed over N)
    # w_ref : (P*Cin, P*Cout)  bf16  block-diagonal weight, (K, N)-oriented (resident)
    # r_ref : (P*Cout, P)      f32   segment reduce: 1/Cout inside each part chunk
    # b_ref : (P, P*Cout)      f32   segment broadcast: 0/1
    # g_ref : (1, P*Cout)      f32   LN gamma tiled per part
    # bt_ref: (1, P*Cout)      f32   LN beta tiled per part
    # o_ref : (Nt, P*Cout)           lane-dense output slab

    # All P per-part Linears (bias=False) as ONE bf16 MXU pass, f32 accumulation.
    y = jnp.dot(x_ref[...], w_ref[...], preferred_element_type=jnp.float32)

    # Segmented LayerNorm statistics on the MXU: reduce each part chunk to its
    # mean (PO -> P), broadcast back (P -> PO).  Two-pass f32 statistics.
    r = r_ref[...]
    b = b_ref[...]
    mean = jnp.dot(jnp.dot(y, r, preferred_element_type=jnp.float32), b,
                   preferred_element_type=jnp.float32)
    d = y - mean
    var = jnp.dot(jnp.dot(d * d, r, preferred_element_type=jnp.float32), b,
                  preferred_element_type=jnp.float32)
    var = jnp.maximum(var, 0.0)  # guard garbage rows of a partial final N tile
    y_hat = d * jax.lax.rsqrt(var + LN_EPS)

    o_ref[...] = (y_hat * g_ref[...] + bt_ref[...]).astype(o_ref.dtype)


# --------------------------------------------------------------------- parameter prep
def prepare_part_block_params(weights, gamma, beta, *,
                              compute_dtype=jnp.bfloat16, out_dtype=jnp.float32):
    """Build kernel operands ONCE from the module parameters (hoisted out of the
    per-forward path).

    weights: (P, Cout, Cin) per-part nn.Linear weights (PyTorch layout).
    gamma/beta: (Cout,) LayerNorm affine parameters.
    """
    P, Cout, Cin = weights.shape
    PK, PO = P * Cin, P * Cout

    # Block-diagonal weight, block (p, p) = W[p].T of shape (Cin, Cout), built with
    # an indexed set (no eye-einsum -> no P x redundant flops / extra HBM pass).
    wt = jnp.transpose(weights, (0, 2, 1)).astype(compute_dtype)     # (P, Cin, Cout)
    idx = jnp.arange(P)
    w_bd = (jnp.zeros((P, Cin, P, Cout), compute_dtype)
            .at[idx, :, idx, :].set(wt)
            .reshape(PK, PO))

    # Factorized per-part LayerNorm segment operators (replaces the dense PO x PO
    # operator: O(P*PO) VMEM / flops instead of PO^2).
    seg_ids = jnp.arange(PO) // Cout
    onehot = (seg_ids[:, None] == jnp.arange(P)[None, :]).astype(jnp.float32)
    seg_reduce = onehot / Cout        # (PO, P): per-part mean
    seg_bcast = onehot.T              # (P, PO): broadcast back to lanes

    gamma2d = jnp.tile(gamma.astype(jnp.float32), P).reshape(1, PO)
    beta2d = jnp.tile(beta.astype(jnp.float32), P).reshape(1, PO)

    # TODO(synk): for larger P (>~8) or larger Cin/Cout, replace the block-diagonal
    # weight with a per-part grid axis — w_bd costs P x the real weight bytes and
    # P x the needed MXU flops and would exhaust v7x's 64 MiB VMEM.
    # TODO(synk): on v6e/v7x, packed dims between 128 and 256 should be padded to
    # multiples of 256 to fill the 256-wide MXU; not needed at PK=PO=128.
    return dict(num_parts=P, in_channels=Cin, out_channels=Cout,
                compute_dtype=jnp.dtype(compute_dtype), out_dtype=jnp.dtype(out_dtype),
                w_bd=w_bd, seg_reduce=seg_reduce, seg_bcast=seg_bcast,
                gamma2d=gamma2d, beta2d=beta2d)


# --------------------------------------------------------------- layout boundary helpers
def pack_parts(x, dtype=None):
    """(P, N, Cin) -> lane-packed (N, P*Cin).  In a real model, keep this packed
    layout end-to-end so the transpose is paid once at the boundary, not per layer."""
    P, N, Cin = x.shape
    xp = jnp.transpose(x, (1, 0, 2)).reshape(N, P * Cin)
    return xp if dtype is None else xp.astype(dtype)


def unpack_parts(y_packed, num_parts, out_channels):
    """(N, P*Cout) -> (P, N, Cout)."""
    N = y_packed.shape[0]
    return jnp.transpose(y_packed.reshape(N, num_parts, out_channels), (1, 0, 2))


# ------------------------------------------------------------------------ pallas wrapper
def _build_call(*, P, Cin, Cout, N, n_tile, out_dtype, vmem_limit_bytes, cost,
                single_buffer_resident):
    PK, PO = P * Cin, P * Cout
    # Resident operands have a constant index_map; single-buffer them so they do
    # not take 2x VMEM (most important on v7x's 64 MiB/TC budget).
    res_kw = {"pipeline_mode": pl.Buffered(1)} if single_buffer_resident else {}
    return pl.pallas_call(
        _part_block_kernel,
        out_shape=jax.ShapeDtypeStruct((N, PO), out_dtype),
        grid_spec=pltpu.PrefetchScalarGridSpec(
            num_scalar_prefetch=0,
            grid=(pl.cdiv(N, n_tile),),
            in_specs=[
                pl.BlockSpec((n_tile, PK), lambda n: (n, 0)),          # x tile (streams)
                pl.BlockSpec((PK, PO), lambda n: (0, 0), **res_kw),    # block-diag W
                pl.BlockSpec((PO, P), lambda n: (0, 0), **res_kw),     # segment reduce
                pl.BlockSpec((P, PO), lambda n: (0, 0), **res_kw),     # segment bcast
                pl.BlockSpec((1, PO), lambda n: (0, 0), **res_kw),     # gamma
                pl.BlockSpec((1, PO), lambda n: (0, 0), **res_kw),     # beta
            ],
            out_specs=pl.BlockSpec((n_tile, PO), lambda n: (n, 0)),    # lane-dense slab
        ),
        compiler_params=pltpu.CompilerParams(
            dimension_semantics=("parallel",),
            vmem_limit_bytes=vmem_limit_bytes,
        ),
        cost_estimate=cost,
    )


def part_block_one_fc_packed(x_packed, params, *, n_tile=None, max_n_tile=512):
    """Lane-packed forward: (N, P*Cin) -> (N, P*Cout)."""
    P = params["num_parts"]
    Cin = params["in_channels"]
    Cout = params["out_channels"]
    PK, PO = P * Cin, P * Cout
    N, pk = x_packed.shape
    assert pk == PK, f"expected packed width {PK}, got {pk}"

    cdt = params["compute_dtype"]
    odt = params["out_dtype"]
    if x_packed.dtype != cdt:
        x_packed = x_packed.astype(cdt)

    if n_tile is None:
        # Aim for >=2 grid steps when N allows it so the 'parallel' axis can shard
        # across v7x's two TensorCores; cap rows/tile at max_n_tile (512 default;
        # v5e's larger VMEM and higher per-step cost favor max_n_tile=1024).
        n_tile = N if N <= 16 else min(max_n_tile, _round_up(pl.cdiv(N, 2), 8))

    # VMEM budget: resident operands (x2 if the Buffered(1) fallback is taken),
    # double-buffered streaming tiles, and f32 temporaries — with slack.
    cbytes = jnp.dtype(cdt).itemsize
    obytes = jnp.dtype(odt).itemsize
    resident = PK * PO * cbytes + (PO * P + P * PO + 2 * PO) * 4
    streaming = 2 * n_tile * (PK * cbytes + PO * obytes)
    interm = 6 * n_tile * PO * 4
    vmem_limit = int(min(64 << 20,
                         max(32 << 20, 2 * resident + streaming + interm + (4 << 20))))

    cost = pl.CostEstimate(
        flops=int(2 * N * PK * PO          # block-diagonal matmul (as executed)
                  + 8 * N * P * PO         # factorized mean/var reduce + broadcast
                  + 8 * N * PO),           # elementwise LN tail
        transcendentals=int(N * PO),       # rsqrt per element of var
        bytes_accessed=int(N * PK * cbytes + PK * PO * cbytes + N * PO * obytes
                           + (PO * P + P * PO + 2 * PO) * 4),
    )

    args = (x_packed, params["w_bd"], params["seg_reduce"], params["seg_bcast"],
            params["gamma2d"], params["beta2d"])
    kw = dict(P=P, Cin=Cin, Cout=Cout, N=N, n_tile=n_tile, out_dtype=odt,
              vmem_limit_bytes=vmem_limit, cost=cost)
    try:
        return _build_call(single_buffer_resident=True, **kw)(*args)
    except Exception:
        # pl.Buffered(1) not supported on this jax version -> identical kernel with
        # default double buffering of the resident operands.
        return _build_call(single_buffer_resident=False, **kw)(*args)


def part_block_one_fc(x, params, **kwargs):
    """Drop-in forward: x (P, N, Cin) -> (P, N, Cout).

    The pack/unpack transposes are model-boundary plumbing; inside a packed-layout
    model use part_block_one_fc_packed directly and skip them."""
    xp = pack_parts(x, params["compute_dtype"])
    yp = part_block_one_fc_packed(xp, params, **kwargs)
    return unpack_parts(yp, params["num_parts"], params["out_channels"])


# ---------------------------------------------------------------------------- reference
def _reference(x, weights, gamma, beta):
    # Pure-JAX reference mirroring the PyTorch forward (f32 throughout).
    y = jnp.einsum("pni,poi->pno", x, weights, precision=jax.lax.Precision.HIGHEST)
    mean = jnp.mean(y, axis=-1, keepdims=True)
    var = jnp.mean((y - mean) ** 2, axis=-1, keepdims=True)
    return (y - mean) / jnp.sqrt(var + LN_EPS) * gamma + beta


if __name__ == "__main__":
    num_parts = 4
    N = 8              # tokens per part
    in_channels = 32
    out_channels = 32

    key = jax.random.PRNGKey(0)
    kx, kw = jax.random.split(key)

    x = jax.random.normal(kx, (num_parts, N, in_channels), dtype=jnp.float32)
    bound = 1.0 / (in_channels ** 0.5)   # Kaiming-uniform-ish Linear init scale
    weights = jax.random.uniform(
        kw, (num_parts, out_channels, in_channels),
        minval=-bound, maxval=bound, dtype=jnp.float32)
    gamma = jnp.ones((out_channels,), dtype=jnp.float32)   # nn.LayerNorm init
    beta = jnp.zeros((out_channels,), dtype=jnp.float32)

    # Operand construction is hoisted: once per parameter set, not per forward.
    params = prepare_part_block_params(weights, gamma, beta,
                                       compute_dtype=jnp.bfloat16)

    out = part_block_one_fc(x, params)
    out = jax.block_until_ready(out)
    assert out.shape == (num_parts, N, out_channels)

    # Tight check vs a bf16-matmul-matched reference, loose check vs the pure-f32
    # reference (tolerance set by the bf16 MXU operands, not by the kernel).
    ref_bf16 = _reference(x.astype(jnp.bfloat16).astype(jnp.float32),
                          weights.astype(jnp.bfloat16).astype(jnp.float32),
                          gamma, beta)
    ref_f32 = _reference(x, weights, gamma, beta)
    assert jnp.allclose(out, ref_bf16, atol=5e-3, rtol=5e-3), "mismatch vs bf16-matched ref"
    assert jnp.allclose(out, ref_f32, atol=5e-2, rtol=5e-2), "mismatch vs f32 reference"

    print("KERNEL_OK")
</pallas_src>

<mosaic_0001>
module attributes {stable_mosaic.version = 11 : i64} {
  func.func @_part_block_kernel(%arg0: i32, %arg1: memref<8x128xbf16, #tpu.memory_space<vmem>>, %arg2: memref<128x128xbf16, #tpu.memory_space<vmem>>, %arg3: memref<128x4xf32, #tpu.memory_space<vmem>>, %arg4: memref<4x128xf32, #tpu.memory_space<vmem>>, %arg5: memref<1x128xf32, #tpu.memory_space<vmem>>, %arg6: memref<1x128xf32, #tpu.memory_space<vmem>>, %arg7: memref<8x128xf32, #tpu.memory_space<vmem>>) attributes {dimension_semantics = [#tpu.dimension_semantics<parallel>], iteration_bounds = array<i64: 1>, scalar_prefetch = 0 : i64, scratch_operands = 0 : i64, tpu.core_type = #tpu.core_type<tc>, window_params = [{transform_indices = @transform_0, window_bounds = array<i64: 8, 128>}, {pipeline_mode = #tpu.pipeline_mode<synchronous>, transform_indices = @transform_1, window_bounds = array<i64: 128, 128>}, {pipeline_mode = #tpu.pipeline_mode<synchronous>, transform_indices = @transform_2, window_bounds = array<i64: 128, 4>}, {pipeline_mode = #tpu.pipeline_mode<synchronous>, transform_indices = @transform_3, window_bounds = array<i64: 4, 128>}, {pipeline_mode = #tpu.pipeline_mode<synchronous>, transform_indices = @transform_4, window_bounds = array<i64: 1, 128>}, {pipeline_mode = #tpu.pipeline_mode<synchronous>, transform_indices = @transform_5, window_bounds = array<i64: 1, 128>}, {transform_indices = @transform_6, window_bounds = array<i64: 8, 128>}]} {
    %c0 = arith.constant 0 : index
    %c0_0 = arith.constant 0 : index
    %0 = vector.load %arg1[%c0, %c0_0] : memref<8x128xbf16, #tpu.memory_space<vmem>>, vector<8x128xbf16>
    %c0_1 = arith.constant 0 : index
    %c0_2 = arith.constant 0 : index
    %1 = vector.load %arg2[%c0_1, %c0_2] : memref<128x128xbf16, #tpu.memory_space<vmem>>, vector<128x128xbf16>
    %cst = arith.constant dense<0.000000e+00> : vector<8x128xf32>
    %2 = tpu.matmul %0, %1, %cst {dimension_numbers = #tpu.dot_dimension_numbers<[1], [0], [0], [1], [0, 0, 1, 1], [], []>} : vector<8x128xbf16>, vector<128x128xbf16>, vector<8x128xf32> -> vector<8x128xf32>
    %c0_3 = arith.constant 0 : index
    %c0_4 = arith.constant 0 : index
    %3 = vector.load %arg3[%c0_3, %c0_4] : memref<128x4xf32, #tpu.memory_space<vmem>>, vector<128x4xf32>
    %c0_5 = arith.constant 0 : index
    %c0_6 = arith.constant 0 : index
    %4 = vector.load %arg4[%c0_5, %c0_6] : memref<4x128xf32, #tpu.memory_space<vmem>>, vector<4x128xf32>
    %cst_7 = arith.constant dense<0.000000e+00> : vector<8x4xf32>
    %5 = tpu.matmul %2, %3, %cst_7 {dimension_numbers = #tpu.dot_dimension_numbers<[1], [0], [0], [1], [0, 0, 1, 1], [], []>} : vector<8x128xf32>, vector<128x4xf32>, vector<8x4xf32> -> vector<8x4xf32>
    %cst_8 = arith.constant dense<0.000000e+00> : vector<8x128xf32>
    %6 = tpu.matmul %5, %4, %cst_8 {dimension_numbers = #tpu.dot_dimension_numbers<[1], [0], [0], [1], [0, 0, 1, 1], [], []>} : vector<8x4xf32>, vector<4x128xf32>, vector<8x128xf32> -> vector<8x128xf32>
    %7 = arith.subf %2, %6 : vector<8x128xf32>
    %8 = arith.mulf %7, %7 : vector<8x128xf32>
    %cst_9 = arith.constant dense<0.000000e+00> : vector<8x4xf32>
    %9 = tpu.matmul %8, %3, %cst_9 {dimension_numbers = #tpu.dot_dimension_numbers<[1], [0], [0], [1], [0, 0, 1, 1], [], []>} : vector<8x128xf32>, vector<128x4xf32>, vector<8x4xf32> -> vector<8x4xf32>
    %cst_10 = arith.constant dense<0.000000e+00> : vector<8x128xf32>
    %10 = tpu.matmul %9, %4, %cst_10 {dimension_numbers = #tpu.dot_dimension_numbers<[1], [0], [0], [1], [0, 0, 1, 1], [], []>} : vector<8x4xf32>, vector<4x128xf32>, vector<8x128xf32> -> vector<8x128xf32>
    %cst_11 = arith.constant 0.000000e+00 : f32
    %11 = vector.broadcast %cst_11 : f32 to vector<8x128xf32>
    %12 = arith.maximumf %10, %11 : vector<8x128xf32>
    %cst_12 = arith.constant 9.99999974E-6 : f32
    %13 = vector.broadcast %cst_12 : f32 to vector<8x128xf32>
    %14 = arith.addf %12, %13 : vector<8x128xf32>
    %15 = math.rsqrt %14 : vector<8x128xf32>
    %16 = arith.mulf %7, %15 : vector<8x128xf32>
    %c0_13 = arith.constant 0 : index
    %c0_14 = arith.constant 0 : index
    %17 = vector.load %arg5[%c0_13, %c0_14] : memref<1x128xf32, #tpu.memory_space<vmem>>, vector<1x128xf32>
    %18 = vector.broadcast %17 : vector<1x128xf32> to vector<8x128xf32>
    %19 = arith.mulf %16, %18 : vector<8x128xf32>
    %c0_15 = arith.constant 0 : index
    %c0_16 = arith.constant 0 : index
    %20 = vector.load %arg6[%c0_15, %c0_16] : memref<1x128xf32, #tpu.memory_space<vmem>>, vector<1x128xf32>
    %21 = vector.broadcast %20 : vector<1x128xf32> to vector<8x128xf32>
    %22 = arith.addf %19, %21 : vector<8x128xf32>
    %c0_17 = arith.constant 0 : index
    %c0_18 = arith.constant 0 : index
    %23 = vector.load %arg7[%c0_17, %c0_18] : memref<8x128xf32, #tpu.memory_space<vmem>>, vector<8x128xf32>
    tpu.vector_store %arg7[%c0_17, %c0_18], %22 {strides = array<i32>} : memref<8x128xf32, #tpu.memory_space<vmem>>, vector<8x128xf32>,
    return
  }
  func.func @transform_0(%arg0: i32) -> (i32, i32) {
    %c0_i32 = arith.constant 0 : i32
    %c0_i32_0 = arith.constant 0 : i32
    return %arg0, %c0_i32 : i32, i32
  }
  func.func @transform_1(%arg0: i32) -> (i32, i32) {
    %c0_i32 = arith.constant 0 : i32
    %c0_i32_0 = arith.constant 0 : i32
    %c0_i32_1 = arith.constant 0 : i32
    return %c0_i32, %c0_i32_0 : i32, i32
  }
  func.func @transform_2(%arg0: i32) -> (i32, i32) {
    %c0_i32 = arith.constant 0 : i32
    %c0_i32_0 = arith.constant 0 : i32
    %c0_i32_1 = arith.constant 0 : i32
    return %c0_i32, %c0_i32_0 : i32, i32
  }
  func.func @transform_3(%arg0: i32) -> (i32, i32) {
    %c0_i32 = arith.constant 0 : i32
    %c0_i32_0 = arith.constant 0 : i32
    %c0_i32_1 = arith.constant 0 : i32
    return %c0_i32, %c0_i32_0 : i32, i32
  }
  func.func @transform_4(%arg0: i32) -> (i32, i32) {
    %c0_i32 = arith.constant 0 : i32
    %c0_i32_0 = arith.constant 0 : i32
    %c0_i32_1 = arith.constant 0 : i32
    return %c0_i32, %c0_i32_0 : i32, i32
  }
  func.func @transform_5(%arg0: i32) -> (i32, i32) {
    %c0_i32 = arith.constant 0 : i32
    %c0_i32_0 = arith.constant 0 : i32
    %c0_i32_1 = arith.constant 0 : i32
    return %c0_i32, %c0_i32_0 : i32, i32
  }
  func.func @transform_6(%arg0: i32) -> (i32, i32) {
    %c0_i32 = arith.constant 0 : i32
    %c0_i32_0 = arith.constant 0 : i32
    return %arg0, %c0_i32 : i32, i32
  }
}

module attributes {stable_mosaic.version = 11 : i64} {
  func.func @_part_block_kernel(%arg0: i32, %arg1: memref<8x128xbf16, #tpu.memory_space<vmem>>, %arg2: memref<128x128xbf16, #tpu.memory_space<vmem>>, %arg3: memref<128x4xf32, #tpu.memory_space<vmem>>, %arg4: memref<4x128xf32, #tpu.memory_space<vmem>>, %arg5: memref<1x128xf32, #tpu.memory_space<vmem>>, %arg6: memref<1x128xf32, #tpu.memory_space<vmem>>, %arg7: memref<8x128xf32, #tpu.memory_space<vmem>>) attributes {dimension_semantics = [#tpu.dimension_semantics<parallel>], iteration_bounds = array<i64: 1>, scalar_prefetch = 0 : i64, scratch_operands = 0 : i64, tpu.core_type = #tpu.core_type<tc>, window_params = [{transform_indices = @transform_0, window_bounds = array<i64: 8, 128>}, {pipeline_mode = #tpu.pipeline_mode<synchronous>, transform_indices = @transform_1, window_bounds = array<i64: 128, 128>}, {pipeline_mode = #tpu.pipeline_mode<synchronous>, transform_indices = @transform_2, window_bounds = array<i64: 128, 4>}, {pipeline_mode = #tpu.pipeline_mode<synchronous>, transform_indices = @transform_3, window_bounds = array<i64: 4, 128>}, {pipeline_mode = #tpu.pipeline_mode<synchronous>, transform_indices = @transform_4, window_bounds = array<i64: 1, 128>}, {pipeline_mode = #tpu.pipeline_mode<synchronous>, transform_indices = @transform_5, window_bounds = array<i64: 1, 128>}, {transform_indices = @transform_6, window_bounds = array<i64: 8, 128>}]} {
    %c0 = arith.constant 0 : index
    %c0_0 = arith.constant 0 : index
    %0 = vector.load %arg1[%c0, %c0_0] : memref<8x128xbf16, #tpu.memory_space<vmem>>, vector<8x128xbf16>
    %c0_1 = arith.constant 0 : index
    %c0_2 = arith.constant 0 : index
    %1 = vector.load %arg2[%c0_1, %c0_2] : memref<128x128xbf16, #tpu.memory_space<vmem>>, vector<128x128xbf16>
    %cst = arith.constant dense<0.000000e+00> : vector<8x128xf32>
    %2 = tpu.matmul %0, %1, %cst {dimension_numbers = #tpu.dot_dimension_numbers<[1], [0], [0], [1], [0, 0, 1, 1], [], []>} : vector<8x128xbf16>, vector<128x128xbf16>, vector<8x128xf32> -> vector<8x128xf32>
    %c0_3 = arith.constant 0 : index
    %c0_4 = arith.constant 0 : index
    %3 = vector.load %arg3[%c0_3, %c0_4] : memref<128x4xf32, #tpu.memory_space<vmem>>, vector<128x4xf32>
    %c0_5 = arith.constant 0 : index
    %c0_6 = arith.constant 0 : index
    %4 = vector.load %arg4[%c0_5, %c0_6] : memref<4x128xf32, #tpu.memory_space<vmem>>, vector<4x128xf32>
    %cst_7 = arith.constant dense<0.000000e+00> : vector<8x4xf32>
    %5 = tpu.matmul %2, %3, %cst_7 {dimension_numbers = #tpu.dot_dimension_numbers<[1], [0], [0], [1], [0, 0, 1, 1], [], []>} : vector<8x128xf32>, vector<128x4xf32>, vector<8x4xf32> -> vector<8x4xf32>
    %cst_8 = arith.constant dense<0.000000e+00> : vector<8x128xf32>
    %6 = tpu.matmul %5, %4, %cst_8 {dimension_numbers = #tpu.dot_dimension_numbers<[1], [0], [0], [1], [0, 0, 1, 1], [], []>} : vector<8x4xf32>, vector<4x128xf32>, vector<8x128xf32> -> vector<8x128xf32>
    %7 = arith.subf %2, %6 : vector<8x128xf32>
    %8 = arith.mulf %7, %7 : vector<8x128xf32>
    %cst_9 = arith.constant dense<0.000000e+00> : vector<8x4xf32>
    %9 = tpu.matmul %8, %3, %cst_9 {dimension_numbers = #tpu.dot_dimension_numbers<[1], [0], [0], [1], [0, 0, 1, 1], [], []>} : vector<8x128xf32>, vector<128x4xf32>, vector<8x4xf32> -> vector<8x4xf32>
    %cst_10 = arith.constant dense<0.000000e+00> : vector<8x128xf32>
    %10 = tpu.matmul %9, %4, %cst_10 {dimension_numbers = #tpu.dot_dimension_numbers<[1], [0], [0], [1], [0, 0, 1, 1], [], []>} : vector<8x4xf32>, vector<4x128xf32>, vector<8x128xf32> -> vector<8x128xf32>
    %cst_11 = arith.constant 0.000000e+00 : f32
    %11 = vector.broadcast %cst_11 : f32 to vector<8x128xf32>
    %12 = arith.maximumf %10, %11 : vector<8x128xf32>
    %cst_12 = arith.constant 9.99999974E-6 : f32
    %13 = vector.broadcast %cst_12 : f32 to vector<8x128xf32>
    %14 = arith.addf %12, %13 : vector<8x128xf32>
    %15 = math.rsqrt %14 : vector<8x128xf32>
    %16 = arith.mulf %7, %15 : vector<8x128xf32>
    %c0_13 = arith.constant 0 : index
    %c0_14 = arith.constant 0 : index
    %17 = vector.load %arg5[%c0_13, %c0_14] : memref<1x128xf32, #tpu.memory_space<vmem>>, vector<1x128xf32>
    %18 = vector.broadcast %17 : vector<1x128xf32> to vector<8x128xf32>
    %19 = arith.mulf %16, %18 : vector<8x128xf32>
    %c0_15 = arith.constant 0 : index
    %c0_16 = arith.constant 0 : index
    %20 = vector.load %arg6[%c0_15, %c0_16] : memref<1x128xf32, #tpu.memory_space<vmem>>, vector<1x128xf32>
    %21 = vector.broadcast %20 : vector<1x128xf32> to vector<8x128xf32>
    %22 = arith.addf %19, %21 : vector<8x128xf32>
    %c0_17 = arith.constant 0 : index
    %c0_18 = arith.constant 0 : index
    %23 = vector.load %arg7[%c0_17, %c0_18] : memref<8x128xf32, #tpu.memory_space<vmem>>, vector<8x128xf32>
    tpu.vector_store %arg7[%c0_17, %c0_18], %22 {strides = array<i32>} : memref<8x128xf32, #tpu.memory_space<vmem>>, vector<8x128xf32>,
    return
  }
  func.func @transform_0(%arg0: i32) -> (i32, i32) {
    %c0_i32 = arith.constant 0 : i32
    %c0_i32_0 = arith.constant 0 : i32
    return %arg0, %c0_i32 : i32, i32
  }
  func.func @transform_1(%arg0: i32) -> (i32, i32) {
    %c0_i32 = arith.constant 0 : i32
    %c0_i32_0 = arith.constant 0 : i32
    %c0_i32_1 = arith.constant 0 : i32
    return %c0_i32, %c0_i32_0 : i32, i32
  }
  func.func @transform_2(%arg0: i32) -> (i32, i32) {
    %c0_i32 = arith.constant 0 : i32
    %c0_i32_0 = arith.constant 0 : i32
    %c0_i32_1 = arith.constant 0 : i32
    return %c0_i32, %c0_i32_0 : i32, i32
  }
  func.func @transform_3(%arg0: i32) -> (i32, i32) {
    %c0_i32 = arith.constant 0 : i32
    %c0_i32_0 = arith.constant 0 : i32
    %c0_i32_1 = arith.constant 0 : i32
    return %c0_i32, %c0_i32_0 : i32, i32
  }
  func.func @transform_4(%arg0: i32) -> (i32, i32) {
    %c0_i32 = arith.constant 0 : i32
    %c0_i32_0 = arith.constant 0 : i32
    %c0_i32_1 = arith.constant 0 : i32
    return %c0_i32, %c0_i32_0 : i32, i32
  }
  func.func @transform_5(%arg0: i32) -> (i32, i32) {
    %c0_i32 = arith.constant 0 : i32
    %c0_i32_0 = arith.constant 0 : i32
    %c0_i32_1 = arith.constant 0 : i32
    return %c0_i32, %c0_i32_0 : i32, i32
  }
  func.func @transform_6(%arg0: i32) -> (i32, i32) {
    %c0_i32 = arith.constant 0 : i32
    %c0_i32_0 = arith.constant 0 : i32
    return %arg0, %c0_i32 : i32, i32
  }
}

</mosaic_0001>

<bundles_post_ra>
// kernel: tpu_custom_call.1
= control target key start
LH: loop header
LB: loop body
LE: loop exit
PB: predicated region body
PF: predicated region fallthrough
CT: control target
= control target key end

     0   :  { %v671_v1 = vmov 0.0   ;;  %vm672_vm0 = vmmov 0   ;;  %s852_s0 = inlined_call_operand.vmem [shape: bf16[8,128], index: 0, kind: input, shape index: {}]   ;;  %s853_s1 = inlined_call_operand.vmem [shape: bf16[128,128], index: 1, kind: input, shape index: {}]   ;;  %s854_s2 = inlined_call_operand.vmem [shape: f32[128,4], index: 2, kind: input, shape index: {}]   ;;  %s855_s3 = inlined_call_operand.vmem [shape: f32[4,128], index: 3, kind: input, shape index: {}]   ;;  %s856_s4 = inlined_call_operand.vmem [shape: f32[1,128], index: 4, kind: input, shape index: {}]   ;;  %s857_s5 = inlined_call_operand.vmem [shape: f32[1,128], index: 5, kind: input, shape index: {}]   ;;  %s858_s6 = inlined_call_operand.hbm [shape: f32[8,128], index: 6, kind: output, shape index: {}]  }
   0x1   :  { %v639_v0 = vld [vmem:[%s853_s1 + $0x38] sm:$0xff]   ;;  %536 = vmatprep.subr.bf16.mxu0 %v671_v1  ;;  %556 = vmatprep.subr.mxu1 %v671_v1  ;;  %v640_v2 = vld [vmem:[%s853_s1 + $0x30] sm:$0xff]   ;;  %v641_v3 = vld [vmem:[%s853_s1 + $0x28] sm:$0xff]  }
   0x2   :  { %537 = vmatpush3.bf16.msra.mxu0 %v639_v0  ;;  %552 = vmatprep.mubr.msk.bf16.mxu0 %vm672_vm0, %v671_v1  ;;  %v145_v4 = vld [vmem:[%s854_s2 + $0x78] sm:$0xff]  ;;  %v732_v5 = vld [vmem:[%s854_s2 + $0x70] sm:$0xff]  ;;  %v642_v6 = vld [vmem:[%s853_s1 + $0x20] sm:$0xff]  }
   0x3   :  { %538 = vmatprep.subr.bf16.mxu0 %v671_v1  ;;  %588 = vmatprep.mubr.msk.f32.mxu1 %vm672_vm0, %v671_v1  ;;  %v143_v7 = vld [vmem:[%s854_s2 + $0x68] sm:$0xff]  ;;  %v142_v8 = vld [vmem:[%s854_s2 + $0x60] sm:$0xff] }
   0x4   :  { %557 = vmatpush3.msra.mxu1 %v145_v4 }
   0x5   :  { %558 = vmatprep.subr.mxu1 %v671_v1 }
   0x6   :  { %539 = vmatpush3.bf16.msra.mxu0 %v640_v2  ;;  %559 = vmatpush3.msra.mxu1 %v732_v5 }
   0x7   :  { %540 = vmatprep.subr.bf16.mxu0 %v671_v1  ;;  %560 = vmatprep.subr.mxu1 %v671_v1 }
   0x8   :  { %561 = vmatpush3.msra.mxu1 %v143_v7 }
   0xa   :  { %541 = vmatpush3.bf16.msra.mxu0 %v641_v3 }
   0xb   :  { %542 = vmatprep.subr.bf16.mxu0 %v671_v1 }
   0xc   :  { %11 = vsyncpa [#allocation3], 0  ;;  %v643_v9 = vld [vmem:[%s853_s1 + $0x18] sm:$0xff]   ;;  %562 = vmatprep.subr.mxu1 %v671_v1  ;;  %v140_v11 = vld [vmem:[%s854_s2 + $0x50] sm:$0xff]  ;;  %vm221_vm1 = vcmask 1043456   ;;  %vm217_vm2 = vcmask 31744  }
   0xd   :  { %v141_v10 = vld [vmem:[%s854_s2 + $0x58] sm:$0xff]  ;;  %563 = vmatpush3.msra.mxu1 %v142_v8  ;;  %v644_v12 = vld [vmem:[%s853_s1 + $0x10] sm:$0xff]   ;;  %v139_v13 = vld [vmem:[%s854_s2 + $0x48] sm:$0xff]  ;;  %s673_s25 = smov [#allocation2]  }
   0xe   :  { %543 = vmatpush3.bf16.msra.mxu0 %v642_v6  ;;  %564 = vmatprep.subr.mxu1 %v671_v1  ;;  %v138_v14 = vld [vmem:[%s854_s2 + $0x40] sm:$0xff]  ;;  %v645_v15 = vld [vmem:[%s853_s1 + $0x8] sm:$0xff]   ;;  %v137_v16 = vld [vmem:[%s854_s2 + $0x38] sm:$0xff]  ;;  %s467_s26 = sshll.u32 %s673_s25, 4  ;;  %s468_s26 = int_to_ptr.vmem [resolvable:$true] %s467_s26 }
   0xf   :  { %544 = vmatprep.subr.bf16.mxu0 %v671_v1  ;;  %565 = vmatpush3.msra.mxu1 %v141_v10  ;;  %v136_v17 = vld [vmem:[%s854_s2 + $0x30] sm:$0xff]  ;;  %v646_v18 = vld [vmem:[%s853_s1] sm:$0xff]   ;;  %v135_v19 = vld [vmem:[%s854_s2 + $0x28] sm:$0xff]  ;;  %s649_s27 = scalar_lea.vmem %s468_s26, 128  ;;  %p654_p1 = scmp.lt.s32.totalorder %s468_s26, %s468_s26 }
  0x10   :  { %566 = vmatprep.subr.mxu1 %v671_v1  ;;  %v134_v20 = vld [vmem:[%s854_s2 + $0x20] sm:$0xff]  ;;  %v133_v22 = vld [vmem:[%s854_s2 + $0x18] sm:$0xff]  ;;  %v132_v23 = vld [vmem:[%s854_s2 + $0x10] sm:$0xff]  ;;  %p650_p0 = scmp.ne.s32.totalorder %s468_s26, %s649_s27  ;;  %p655_p2 = scmp.lt.s32.totalorder %s649_s27, %s649_s27 }
  0x11   :  { %567 = vmatpush3.msra.mxu1 %v140_v11  ;;  %v25_v21 = vld [vmem:[%s852_s0] sm:$0xf]  ;;  %v131_v24 = vld [vmem:[%s854_s2 + $0x8] sm:$0xff] }
  0x12   :  { %545 = vmatpush3.bf16.msra.mxu0 %v643_v9  ;;  %568 = vmatprep.subr.mxu1 %v671_v1  ;;  %v130_v25 = vld [vmem:[%s854_s2] sm:$0xff]  ;;  %p656_p3 = por %p655_p2, %p654_p1 }
  0x13   :  { %546 = vmatprep.subr.bf16.mxu0 %v671_v1  ;;  %569 = vmatpush3.msra.mxu1 %v139_v13  ;;  %v146_v26 = vld [vmem:[%s855_s3] sm:$0xf] }
  0x14   :  { %570 = vmatprep.subr.mxu1 %v671_v1  ;;  %v487_v44 = vld [vmem:[%s856_s4] ss:$0 sm:$0xff]  ;;  %p657_p4 = pnand %p656_p3, %p650_p0 }
  0x15   :  { %571 = vmatpush3.msra.mxu1 %v138_v14  ;;  %v488_v46 = vld [vmem:[%s857_s5] ss:$0 sm:$0xff] }
  0x16   :  { %547 = vmatpush3.bf16.msra.mxu0 %v644_v12  ;;  %572 = vmatprep.subr.mxu1 %v671_v1 }
  0x17   :  { %548 = vmatprep.subr.bf16.mxu0 %v671_v1  ;;  %573 = vmatpush3.msra.mxu1 %v137_v16 }
  0x18   :  { %574 = vmatprep.subr.mxu1 %v671_v1 }
  0x19   :  { %575 = vmatpush3.msra.mxu1 %v136_v17 }
  0x1a   :  { %549 = vmatpush3.bf16.msra.mxu0 %v645_v15  ;;  %576 = vmatprep.subr.mxu1 %v671_v1 }
  0x1b   :  { %550 = vmatprep.subr.bf16.mxu0 %v671_v1  ;;  %577 = vmatpush3.msra.mxu1 %v135_v19 }
  0x1c   :  { %578 = vmatprep.subr.mxu1 %v671_v1 }
  0x1d   :  { %579 = vmatpush3.msra.mxu1 %v134_v20 }
  0x1e   :  { %551 = vmatpush3.bf16.msra.mxu0 %v646_v18  ;;  %580 = vmatprep.subr.mxu1 %v671_v1 }
  0x1f   :  { %596 = vmatprep.subr.mxu0 %v671_v1  ;;  %581 = vmatpush3.msra.mxu1 %v133_v22 }
  0x20   :  { %582 = vmatprep.subr.mxu1 %v671_v1 }
  0x21   :  { %553 = vmatmul.mubr.bf16.vlgmr.msra.gmra.mxu0 %v25_v21  ;;  %583 = vmatpush3.msra.mxu1 %v132_v23 }
  0x22   :  { %597 = vmatpush3.msra.mxu0 %v145_v4  ;;  %584 = vmatprep.subr.mxu1 %v671_v1 }
  0x23   :  { %598 = vmatprep.subr.mxu0 %v671_v1  ;;  %585 = vmatpush3.msra.mxu1 %v131_v24 }
  0x24   :  { %599 = vmatpush3.msra.mxu0 %v732_v5  ;;  %586 = vmatprep.subr.mxu1 %v671_v1 }
  0x25   :  { %600 = vmatprep.subr.mxu0 %v671_v1  ;;  %628 = vmatprep.mubr.msk.f32.mxu0 %vm672_vm0, %v671_v1 }
  0x26   :  { %601 = vmatpush3.msra.mxu0 %v143_v7  ;;  %587 = vmatpush3.msra.mxu1 %v130_v25 }
  0x27   :  { %602 = vmatprep.subr.mxu0 %v671_v1  ;;  %591 = vmatprep.subr.mxu1 %v671_v1 }
  0x28   :  { %603 = vmatpush3.msra.mxu0 %v142_v8 }
  0x29   :  { %604 = vmatprep.subr.mxu0 %v671_v1 }
  0x2a   :  { %605 = vmatpush3.msra.mxu0 %v141_v10 }
  0x2b   :  { %606 = vmatprep.subr.mxu0 %v671_v1 }
  0x2c   :  { %607 = vmatpush3.msra.mxu0 %v140_v11 }
  0x2d   :  { %608 = vmatprep.subr.mxu0 %v671_v1 }
  0x2e   :  { %609 = vmatpush3.msra.mxu0 %v139_v13 }
  0x2f   :  { %610 = vmatprep.subr.mxu0 %v671_v1 }
  0x30   :  { %611 = vmatpush3.msra.mxu0 %v138_v14 }
  0x31   :  { %612 = vmatprep.subr.mxu0 %v671_v1 }
  0x32   :  { %613 = vmatpush3.msra.mxu0 %v137_v16 }
  0x33   :  { %614 = vmatprep.subr.mxu0 %v671_v1 }
  0x34   :  { %615 = vmatpush3.msra.mxu0 %v136_v17 }
  0x35   :  { %616 = vmatprep.subr.mxu0 %v671_v1 }
  0x36   :  { %617 = vmatpush3.msra.mxu0 %v135_v19 }
  0x37   :  { %618 = vmatprep.subr.mxu0 %v671_v1 }
  0x38   :  { %619 = vmatpush3.msra.mxu0 %v134_v20 }
  0x39   :  { %620 = vmatprep.subr.mxu0 %v671_v1 }
  0x3a   :  { %621 = vmatpush3.msra.mxu0 %v133_v22 }
  0x3b   :  { %622 = vmatprep.subr.mxu0 %v671_v1 }
  0x3c   :  { %623 = vmatpush3.msra.mxu0 %v132_v23 }
  0x3d   :  { %624 = vmatprep.subr.mxu0 %v671_v1 }
  0x3e   :  { %625 = vmatpush3.msra.mxu0 %v131_v24 }
  0x3f   :  { %626 = vmatprep.subr.mxu0 %v671_v1 }
  0x40   :  { %627 = vmatpush3.msra.mxu0 %v130_v25 }
  0xe1   :  { %v124_v27 = vpop.f32.mrf.mxu0 }
  0xe2   :  { %589 = vmatmul.mubr.f32.vlgmr.msra.gmra.mxu1 %v124_v27 }
  0xe3   :  { %v554_v28 = vpop.f32.mrf.mxu0  ;;  %592 = vmatpush3.msk.msra.mxu1 %vm221_vm1, %v146_v26  ;;  %593 = vmatprep.mubr.msk.f32.mxu1 %vm672_vm0, %v671_v1 }
  0xe4   :  { %631 = vmatprep.subr.mxu1 %v671_v1 }
  0xe5   :  { %v127_v29 = vpop.f32.mrf.mxu0 }
  0xe7   :  { %v555_v30 = vpop.f32.mrf.mxu0 }
 0x1a2   :  { %v213_v31 = vpop.f32.mrf.mxu1 }
 0x1a3   :  { %594 = vmatmul.mubr.msk.f32.vlgmr.msra.gmra.mxu1 %vm217_vm2, %v213_v31 }
 0x1a4   :  { %v590_v32 = vpop.f32.mrf.mxu1  ;;  %632 = vmatpush3.msk.msra.mxu1 %vm221_vm1, %v146_v26  ;;  %633 = vmatprep.mubr.msk.f32.mxu1 %vm672_vm0, %v671_v1 }
 0x263   :  { %v291_v33 = vpop.f32.mrf.mxu1 }
 0x264   :  { %v295_v34 = vsub.f32 %v124_v27, %v291_v33 }
 0x265   :  { %v595_v35 = vpop.f32.mrf.mxu1 }
 0x266   :  { %v296_v36 = vmul.f32 %v295_v34, %v295_v34 }
 0x268   :  { %629 = vmatmul.mubr.f32.vlgmr.msra.gmra.mxu0 %v296_v36 }
 0x328   :  { %v363_v37 = vpop.f32.mrf.mxu0 }
 0x329   :  { %634 = vmatmul.mubr.msk.f32.vlgmr.msra.gmra.mxu1 %vm217_vm2, %v363_v37 }
 0x32a   :  { %v630_v38 = vpop.f32.mrf.mxu0 }
 0x3e9   :  { %v436_v39 = vpop.f32.mrf.mxu1 }
 0x3ea   :  { %v440_v40 = vmax.f32 %v436_v39, 0.0 }
 0x3eb   :  { %v635_v41 = vpop.f32.mrf.mxu1 }
 0x3ec   :  { %v441_v42 = vadd.f32 1e-05, %v440_v40 }
 0x3ee   :  { %647 = vrsqrt.f32 %v441_v42 }
 0x3fb   :  { %v648_v43 = vpop.eup %647 }
 0x3fc   :  { %v443_v45 = vmul.f32 %v648_v43, %v295_v34 }
 0x3fe   :  { %v451_v47 = vmul.f32 %v487_v44, %v443_v45 }
 0x400   :  { %v459_v48 = vadd.f32 %v488_v46, %v451_v47 }
 0x402   :  { %460 = vst [vmem:[#allocation2] sm:$0xff] %v459_v48 }
 0x403   :  { %660 = shalt.err (!%p657_p4)
}
 0x404   :  { %470 = dma.vmem_to_hbm [thread:$0]  %s468_s26, 128, %s858_s6, [#allocation3]  }
 0x405   :  { %669 = dma.done.wait [#allocation3], 128  }
 0x406   :  { %670 = vsyncadd [#allocation3], 4294967168 }
 0x407   :  { %474 = vsyncpa [#allocation3], 1 }

// kernel: tpu_custom_call.1
= control target key start
LH: loop header
LB: loop body
LE: loop exit
PB: predicated region body
PF: predicated region fallthrough
CT: control target
= control target key end

     0   :  { %v671_v1 = vmov 0.0   ;;  %vm672_vm0 = vmmov 0   ;;  %s852_s0 = inlined_call_operand.vmem [shape: bf16[8,128], index: 0, kind: input, shape index: {}]   ;;  %s853_s1 = inlined_call_operand.vmem [shape: bf16[128,128], index: 1, kind: input, shape index: {}]   ;;  %s854_s2 = inlined_call_operand.vmem [shape: f32[128,4], index: 2, kind: input, shape index: {}]   ;;  %s855_s3 = inlined_call_operand.vmem [shape: f32[4,128], index: 3, kind: input, shape index: {}]   ;;  %s856_s4 = inlined_call_operand.vmem [shape: f32[1,128], index: 4, kind: input, shape index: {}]   ;;  %s857_s5 = inlined_call_operand.vmem [shape: f32[1,128], index: 5, kind: input, shape index: {}]   ;;  %s858_s6 = inlined_call_operand.hbm [shape: f32[8,128], index: 6, kind: output, shape index: {}]  }
   0x1   :  { %v639_v0 = vld [vmem:[%s853_s1 + $0x38] sm:$0xff]   ;;  %536 = vmatprep.subr.bf16.mxu0 %v671_v1  ;;  %556 = vmatprep.subr.mxu1 %v671_v1  ;;  %v640_v2 = vld [vmem:[%s853_s1 + $0x30] sm:$0xff]   ;;  %v641_v3 = vld [vmem:[%s853_s1 + $0x28] sm:$0xff]  }
   0x2   :  { %537 = vmatpush3.bf16.msra.mxu0 %v639_v0  ;;  %552 = vmatprep.mubr.msk.bf16.mxu0 %vm672_vm0, %v671_v1  ;;  %v145_v4 = vld [vmem:[%s854_s2 + $0x78] sm:$0xff]  ;;  %v732_v5 = vld [vmem:[%s854_s2 + $0x70] sm:$0xff]  ;;  %v642_v6 = vld [vmem:[%s853_s1 + $0x20] sm:$0xff]  }
   0x3   :  { %538 = vmatprep.subr.bf16.mxu0 %v671_v1  ;;  %588 = vmatprep.mubr.msk.f32.mxu1 %vm672_vm0, %v671_v1  ;;  %v143_v7 = vld [vmem:[%s854_s2 + $0x68] sm:$0xff]  ;;  %v142_v8 = vld [vmem:[%s854_s2 + $0x60] sm:$0xff] }
   0x4   :  { %557 = vmatpush3.msra.mxu1 %v145_v4 }
   0x5   :  { %558 = vmatprep.subr.mxu1 %v671_v1 }
   0x6   :  { %539 = vmatpush3.bf16.msra.mxu0 %v640_v2  ;;  %559 = vmatpush3.msra.mxu1 %v732_v5 }
   0x7   :  { %540 = vmatprep.subr.bf16.mxu0 %v671_v1  ;;  %560 = vmatprep.subr.mxu1 %v671_v1 }
   0x8   :  { %561 = vmatpush3.msra.mxu1 %v143_v7 }
   0xa   :  { %541 = vmatpush3.bf16.msra.mxu0 %v641_v3 }
   0xb   :  { %542 = vmatprep.subr.bf16.mxu0 %v671_v1 }
   0xc   :  { %11 = vsyncpa [#allocation3], 0  ;;  %v643_v9 = vld [vmem:[%s853_s1 + $0x18] sm:$0xff]   ;;  %562 = vmatprep.subr.mxu1 %v671_v1  ;;  %v140_v11 = vld [vmem:[%s854_s2 + $0x50] sm:$0xff]  ;;  %vm221_vm1 = vcmask 1043456   ;;  %vm217_vm2 = vcmask 31744  }
   0xd   :  { %v141_v10 = vld [vmem:[%s854_s2 + $0x58] sm:$0xff]  ;;  %563 = vmatpush3.msra.mxu1 %v142_v8  ;;  %v644_v12 = vld [vmem:[%s853_s1 + $0x10] sm:$0xff]   ;;  %v139_v13 = vld [vmem:[%s854_s2 + $0x48] sm:$0xff]  ;;  %s673_s25 = smov [#allocation2]  }
   0xe   :  { %543 = vmatpush3.bf16.msra.mxu0 %v642_v6  ;;  %564 = vmatprep.subr.mxu1 %v671_v1  ;;  %v138_v14 = vld [vmem:[%s854_s2 + $0x40] sm:$0xff]  ;;  %v645_v15 = vld [vmem:[%s853_s1 + $0x8] sm:$0xff]   ;;  %v137_v16 = vld [vmem:[%s854_s2 + $0x38] sm:$0xff]  ;;  %s467_s26 = sshll.u32 %s673_s25, 4  ;;  %s468_s26 = int_to_ptr.vmem [resolvable:$true] %s467_s26 }
   0xf   :  { %544 = vmatprep.subr.bf16.mxu0 %v671_v1  ;;  %565 = vmatpush3.msra.mxu1 %v141_v10  ;;  %v136_v17 = vld [vmem:[%s854_s2 + $0x30] sm:$0xff]  ;;  %v646_v18 = vld [vmem:[%s853_s1] sm:$0xff]   ;;  %v135_v19 = vld [vmem:[%s854_s2 + $0x28] sm:$0xff]  ;;  %s649_s27 = scalar_lea.vmem %s468_s26, 128  ;;  %p654_p1 = scmp.lt.s32.totalorder %s468_s26, %s468_s26 }
  0x10   :  { %566 = vmatprep.subr.mxu1 %v671_v1  ;;  %v134_v20 = vld [vmem:[%s854_s2 + $0x20] sm:$0xff]  ;;  %v133_v22 = vld [vmem:[%s854_s2 + $0x18] sm:$0xff]  ;;  %v132_v23 = vld [vmem:[%s854_s2 + $0x10] sm:$0xff]  ;;  %p650_p0 = scmp.ne.s32.totalorder %s468_s26, %s649_s27  ;;  %p655_p2 = scmp.lt.s32.totalorder %s649_s27, %s649_s27 }
  0x11   :  { %567 = vmatpush3.msra.mxu1 %v140_v11  ;;  %v25_v21 = vld [vmem:[%s852_s0] sm:$0xf]  ;;  %v131_v24 = vld [vmem:[%s854_s2 + $0x8] sm:$0xff] }
  0x12   :  { %545 = vmatpush3.bf16.msra.mxu0 %v643_v9  ;;  %568 = vmatprep.subr.mxu1 %v671_v1  ;;  %v130_v25 = vld [vmem:[%s854_s2] sm:$0xff]  ;;  %p656_p3 = por %p655_p2, %p654_p1 }
  0x13   :  { %546 = vmatprep.subr.bf16.mxu0 %v671_v1  ;;  %569 = vmatpush3.msra.mxu1 %v139_v13  ;;  %v146_v26 = vld [vmem:[%s855_s3] sm:$0xf] }
  0x14   :  { %570 = vmatprep.subr.mxu1 %v671_v1  ;;  %v487_v44 = vld [vmem:[%s856_s4] ss:$0 sm:$0xff]  ;;  %p657_p4 = pnand %p656_p3, %p650_p0 }
  0x15   :  { %571 = vmatpush3.msra.mxu1 %v138_v14  ;;  %v488_v46 = vld [vmem:[%s857_s5] ss:$0 sm:$0xff] }
  0x16   :  { %547 = vmatpush3.bf16.msra.mxu0 %v644_v12  ;;  %572 = vmatprep.subr.mxu1 %v671_v1 }
  0x17   :  { %548 = vmatprep.subr.bf16.mxu0 %v671_v1  ;;  %573 = vmatpush3.msra.mxu1 %v137_v16 }
  0x18   :  { %574 = vmatprep.subr.mxu1 %v671_v1 }
  0x19   :  { %575 = vmatpush3.msra.mxu1 %v136_v17 }
  0x1a   :  { %549 = vmatpush3.bf16.msra.mxu0 %v645_v15  ;;  %576 = vmatprep.subr.mxu1 %v671_v1 }
  0x1b   :  { %550 = vmatprep.subr.bf16.mxu0 %v671_v1  ;;  %577 = vmatpush3.msra.mxu1 %v135_v19 }
  0x1c   :  { %578 = vmatprep.subr.mxu1 %v671_v1 }
  0x1d   :  { %579 = vmatpush3.msra.mxu1 %v134_v20 }
  0x1e   :  { %551 = vmatpush3.bf16.msra.mxu0 %v646_v18  ;;  %580 = vmatprep.subr.mxu1 %v671_v1 }
  0x1f   :  { %596 = vmatprep.subr.mxu0 %v671_v1  ;;  %581 = vmatpush3.msra.mxu1 %v133_v22 }
  0x20   :  { %582 = vmatprep.subr.mxu1 %v671_v1 }
  0x21   :  { %553 = vmatmul.mubr.bf16.vlgmr.msra.gmra.mxu0 %v25_v21  ;;  %583 = vmatpush3.msra.mxu1 %v132_v23 }
  0x22   :  { %597 = vmatpush3.msra.mxu0 %v145_v4  ;;  %584 = vmatprep.subr.mxu1 %v671_v1 }
  0x23   :  { %598 = vmatprep.subr.mxu0 %v671_v1  ;;  %585 = vmatpush3.msra.mxu1 %v131_v24 }
  0x24   :  { %599 = vmatpush3.msra.mxu0 %v732_v5  ;;  %586 = vmatprep.subr.mxu1 %v671_v1 }
  0x25   :  { %600 = vmatprep.subr.mxu0 %v671_v1  ;;  %628 = vmatprep.mubr.msk.f32.mxu0 %vm672_vm0, %v671_v1 }
  0x26   :  { %601 = vmatpush3.msra.mxu0 %v143_v7  ;;  %587 = vmatpush3.msra.mxu1 %v130_v25 }
  0x27   :  { %602 = vmatprep.subr.mxu0 %v671_v1  ;;  %591 = vmatprep.subr.mxu1 %v671_v1 }
  0x28   :  { %603 = vmatpush3.msra.mxu0 %v142_v8 }
  0x29   :  { %604 = vmatprep.subr.mxu0 %v671_v1 }
  0x2a   :  { %605 = vmatpush3.msra.mxu0 %v141_v10 }
  0x2b   :  { %606 = vmatprep.subr.mxu0 %v671_v1 }
  0x2c   :  { %607 = vmatpush3.msra.mxu0 %v140_v11 }
  0x2d   :  { %608 = vmatprep.subr.mxu0 %v671_v1 }
  0x2e   :  { %609 = vmatpush3.msra.mxu0 %v139_v13 }
  0x2f   :  { %610 = vmatprep.subr.mxu0 %v671_v1 }
  0x30   :  { %611 = vmatpush3.msra.mxu0 %v138_v14 }
  0x31   :  { %612 = vmatprep.subr.mxu0 %v671_v1 }
  0x32   :  { %613 = vmatpush3.msra.mxu0 %v137_v16 }
  0x33   :  { %614 = vmatprep.subr.mxu0 %v671_v1 }
  0x34   :  { %615 = vmatpush3.msra.mxu0 %v136_v17 }
  0x35   :  { %616 = vmatprep.subr.mxu0 %v671_v1 }
  0x36   :  { %617 = vmatpush3.msra.mxu0 %v135_v19 }
  0x37   :  { %618 = vmatprep.subr.mxu0 %v671_v1 }
  0x38   :  { %619 = vmatpush3.msra.mxu0 %v134_v20 }
  0x39   :  { %620 = vmatprep.subr.mxu0 %v671_v1 }
  0x3a   :  { %621 = vmatpush3.msra.mxu0 %v133_v22 }
  0x3b   :  { %622 = vmatprep.subr.mxu0 %v671_v1 }
  0x3c   :  { %623 = vmatpush3.msra.mxu0 %v132_v23 }
  0x3d   :  { %624 = vmatprep.subr.mxu0 %v671_v1 }
  0x3e   :  { %625 = vmatpush3.msra.mxu0 %v131_v24 }
  0x3f   :  { %626 = vmatprep.subr.mxu0 %v671_v1 }
  0x40   :  { %627 = vmatpush3.msra.mxu0 %v130_v25 }
  0xe1   :  { %v124_v27 = vpop.f32.mrf.mxu0 }
  0xe2   :  { %589 = vmatmul.mubr.f32.vlgmr.msra.gmra.mxu1 %v124_v27 }
  0xe3   :  { %v554_v28 = vpop.f32.mrf.mxu0  ;;  %592 = vmatpush3.msk.msra.mxu1 %vm221_vm1, %v146_v26  ;;  %593 = vmatprep.mubr.msk.f32.mxu1 %vm672_vm0, %v671_v1 }
  0xe4   :  { %631 = vmatprep.subr.mxu1 %v671_v1 }
  0xe5   :  { %v127_v29 = vpop.f32.mrf.mxu0 }
  0xe7   :  { %v555_v30 = vpop.f32.mrf.mxu0 }
 0x1a2   :  { %v213_v31 = vpop.f32.mrf.mxu1 }
 0x1a3   :  { %594 = vmatmul.mubr.msk.f32.vlgmr.msra.gmra.mxu1 %vm217_vm2, %v213_v31 }
 0x1a4   :  { %v590_v32 = vpop.f32.mrf.mxu1  ;;  %632 = vmatpush3.msk.msra.mxu1 %vm221_vm1, %v146_v26  ;;  %633 = vmatprep.mubr.msk.f32.mxu1 %vm672_vm0, %v671_v1 }
 0x263   :  { %v291_v33 = vpop.f32.mrf.mxu1 }
 0x264   :  { %v295_v34 = vsub.f32 %v124_v27, %v291_v33 }
 0x265   :  { %v595_v35 = vpop.f32.mrf.mxu1 }
 0x266   :  { %v296_v36 = vmul.f32 %v295_v34, %v295_v34 }
 0x268   :  { %629 = vmatmul.mubr.f32.vlgmr.msra.gmra.mxu0 %v296_v36 }
 0x328   :  { %v363_v37 = vpop.f32.mrf.mxu0 }
 0x329   :  { %634 = vmatmul.mubr.msk.f32.vlgmr.msra.gmra.mxu1 %vm217_vm2, %v363_v37 }
 0x32a   :  { %v630_v38 = vpop.f32.mrf.mxu0 }
 0x3e9   :  { %v436_v39 = vpop.f32.mrf.mxu1 }
 0x3ea   :  { %v440_v40 = vmax.f32 %v436_v39, 0.0 }
 0x3eb   :  { %v635_v41 = vpop.f32.mrf.mxu1 }
 0x3ec   :  { %v441_v42 = vadd.f32 1e-05, %v440_v40 }
 0x3ee   :  { %647 = vrsqrt.f32 %v441_v42 }
 0x3fb   :  { %v648_v43 = vpop.eup %647 }
 0x3fc   :  { %v443_v45 = vmul.f32 %v648_v43, %v295_v34 }
 0x3fe   :  { %v451_v47 = vmul.f32 %v487_v44, %v443_v45 }
 0x400   :  { %v459_v48 = vadd.f32 %v488_v46, %v451_v47 }
 0x402   :  { %460 = vst [vmem:[#allocation2] sm:$0xff] %v459_v48 }
 0x403   :  { %660 = shalt.err (!%p657_p4)
}
 0x404   :  { %470 = dma.vmem_to_hbm [thread:$0]  %s468_s26, 128, %s858_s6, [#allocation3]  }
 0x405   :  { %669 = dma.done.wait [#allocation3], 128  }
 0x406   :  { %670 = vsyncadd [#allocation3], 4294967168 }
 0x407   :  { %474 = vsyncpa [#allocation3], 1 }

</bundles_post_ra>
